<compile_context>
chip_gen: v7x
topology: tpu7x:2x2x1
jax: 0.10.0
libtpu: 0.0.40
codegen_flags: <defaults>
</compile_context>

<pallas_src>
import jax
import jax.numpy as jnp
from jax.experimental import pallas as pl
from jax.experimental.pallas import tpu as pltpu


def lstm_kernel(x_ref, w_ih_ref, w_hh_ref, b_ref, h0_ref, c0_ref, out_ref):
    """Single-layer LSTM, batch=1, T static and fully unrolled.

    x_ref:    (T, I)      input sequence
    w_ih_ref: (I, 4H)     pre-transposed, column-pre-scaled input weights
    w_hh_ref: (H, 4H)     pre-transposed, column-pre-scaled recurrent weights
    b_ref:    (1, 4H)     b_ih + b_hh, column-pre-scaled
    h0_ref:   (1, H)      initial hidden state
    c0_ref:   (1, H)      initial cell state
    out_ref:  (T+1, H)    rows 0..T-1 = h_t, row T = c_T
    """
    T = x_ref.shape[0]
    H = h0_ref.shape[1]

    # Input projection for all timesteps at once on the MXU (off the serial chain):
    # (T, I) @ (I, 4H) + b -> (T, 4H), already pre-scaled per gate segment.
    xproj = jnp.dot(x_ref[...], w_ih_ref[...],
                    preferred_element_type=jnp.float32) + b_ref[...]

    # Recurrent weight loaded once; stays resident across the unrolled steps.
    w_hh = w_hh_ref[...]                      # (H, 4H)

    # Full-row affine mapping tanh(0.5*x) -> sigmoid(x) on the i/f/o lane segments and
    # identity on the g segment.  Compile-time constants, hoisted out of the loop.
    lane = jax.lax.broadcasted_iota(jnp.int32, (1, 4 * H), 1)
    is_g = (lane >= 2 * H) & (lane < 3 * H)
    a_row = jnp.where(is_g, 1.0, 0.5).astype(jnp.float32)
    b_row = jnp.where(is_g, 0.0, 0.5).astype(jnp.float32)

    h = h0_ref[...]                           # (1, H)
    c = c0_ref[...]                           # (1, H)

    # T is a small, static trip count -> fully unroll: static slices of xproj and
    # cross-step scheduling visibility for the LLO scheduler.
    for t in range(T):
        # (1, 4H): precomputed input part (static slice) + recurrent matvec on the MXU.
        gates = xproj[t:t + 1, :] + jnp.dot(
            h, w_hh, preferred_element_type=jnp.float32)

        # Single EUP transcendental over the full 128-lane gates row, then one
        # full-row VPU FMA: i/f/o segments become sigmoid, g segment stays tanh.
        act = jnp.tanh(gates) * a_row + b_row

        i = act[:, 0 * H:1 * H]
        f = act[:, 1 * H:2 * H]
        g = act[:, 2 * H:3 * H]
        o = act[:, 3 * H:4 * H]

        c = f * c + i * g
        h = o * jnp.tanh(c)

        # Per-step store: issues into idle vst slots while MXU/EUP of the next step
        # are busy; avoids keeping 8 extra vregs live and a concat epilogue.
        out_ref[t:t + 1, :] = h

    # Final cell state in the last row (h_n == row T-1, sliced outside the kernel).
    out_ref[T:T + 1, :] = c


def prepare_params(w_ih, w_hh, b_ih, b_hh):
    """One-time parameter prep (hoisted out of the per-call path).

    Transposes the PyTorch-layout weights and folds the 0.5 pre-scale used by the
    sigmoid-via-tanh trick (sigmoid(x) = 0.5*tanh(0.5*x) + 0.5) into the i/f/o gate
    columns of the weights and bias.  Gate order (i, f, g, o) is preserved.
    """
    H = w_hh.shape[1]
    seg_scale = jnp.concatenate([
        jnp.full((H,), 0.5, jnp.float32),   # i  (sigmoid)
        jnp.full((H,), 0.5, jnp.float32),   # f  (sigmoid)
        jnp.full((H,), 1.0, jnp.float32),   # g  (tanh)
        jnp.full((H,), 0.5, jnp.float32),   # o  (sigmoid)
    ])
    w_ih_t = (jnp.transpose(w_ih).astype(jnp.float32) * seg_scale)        # (I, 4H)
    w_hh_t = (jnp.transpose(w_hh).astype(jnp.float32) * seg_scale)        # (H, 4H)
    b = ((b_ih + b_hh).astype(jnp.float32) * seg_scale).reshape(1, -1)    # (1, 4H)
    return w_ih_t, w_hh_t, b


@jax.jit
def username_encoder_forward(x, params, hidden):
    """x: (T, 1, I) or (T, I). params from prepare_params. hidden = (h0, c0), (1,1,H).
    Returns (output (T,1,H), (h_n (1,1,H), c_n (1,1,H))) like the PyTorch module.
    Fully jitted: the pallas_call plus all reshapes are a single dispatch."""
    w_ih_t, w_hh_t, b = params
    h0, c0 = hidden
    T = x.shape[0]
    H = h0.shape[-1]

    x2 = x.reshape(T, -1).astype(jnp.float32)
    vmem = pl.BlockSpec(memory_space=pltpu.MemorySpace.VMEM)

    buf = pl.pallas_call(
        lstm_kernel,
        out_shape=jax.ShapeDtypeStruct((T + 1, H), jnp.float32),
        in_specs=[vmem] * 6,
        out_specs=vmem,
    )(x2, w_ih_t, w_hh_t, b,
      h0.reshape(1, H).astype(jnp.float32),
      c0.reshape(1, H).astype(jnp.float32))

    output = buf[:T].reshape(T, 1, H)
    h_n = buf[T - 1:T].reshape(1, 1, H)
    c_n = buf[T:T + 1].reshape(1, 1, H)
    return output, (h_n, c_n)


def _reference_lstm(x2, w_ih, w_hh, b_ih, b_hh, h0, c0):
    """Pure-JAX reference of PyTorch single-layer LSTM (batch=1), PyTorch gate order."""
    H = h0.shape[-1]
    h = h0.reshape(1, H)
    c = c0.reshape(1, H)
    outs = []
    for t in range(x2.shape[0]):
        gates = x2[t:t + 1] @ w_ih.T + b_ih + h @ w_hh.T + b_hh
        i = jax.nn.sigmoid(gates[:, 0 * H:1 * H])
        f = jax.nn.sigmoid(gates[:, 1 * H:2 * H])
        g = jnp.tanh(gates[:, 2 * H:3 * H])
        o = jax.nn.sigmoid(gates[:, 3 * H:4 * H])
        c = f * c + i * g
        h = o * jnp.tanh(c)
        outs.append(h)
    return jnp.concatenate(outs, axis=0), h, c


if __name__ == "__main__":
    seq_len = 8
    input_size = 16
    hidden_size = 32

    key = jax.random.PRNGKey(0)
    k_x, k_wih, k_whh, k_bih, k_bhh = jax.random.split(key, 5)

    # PyTorch nn.LSTM default init: U(-stdv, stdv), stdv = 1/sqrt(hidden_size)
    stdv = 1.0 / (hidden_size ** 0.5)
    w_ih = jax.random.uniform(k_wih, (4 * hidden_size, input_size),
                              minval=-stdv, maxval=stdv, dtype=jnp.float32)
    w_hh = jax.random.uniform(k_whh, (4 * hidden_size, hidden_size),
                              minval=-stdv, maxval=stdv, dtype=jnp.float32)
    b_ih = jax.random.uniform(k_bih, (4 * hidden_size,),
                              minval=-stdv, maxval=stdv, dtype=jnp.float32)
    b_hh = jax.random.uniform(k_bhh, (4 * hidden_size,),
                              minval=-stdv, maxval=stdv, dtype=jnp.float32)

    # input as in forward(): input.view(len(input), 1, -1)
    x = jax.random.normal(k_x, (seq_len, 1, input_size), dtype=jnp.float32)

    # initHidden(): zeros (n_layers=1, 1, hidden_size)
    h0 = jnp.zeros((1, 1, hidden_size), jnp.float32)
    c0 = jnp.zeros((1, 1, hidden_size), jnp.float32)

    params = prepare_params(w_ih, w_hh, b_ih, b_hh)   # one-time weight prep
    output, (h_n, c_n) = username_encoder_forward(x, params, (h0, c0))
    jax.block_until_ready((output, h_n, c_n))

    # sanity check against pure-JAX reference
    ref_out, ref_h, ref_c = _reference_lstm(
        x.reshape(seq_len, input_size), w_ih, w_hh, b_ih, b_hh, h0, c0)
    assert jnp.allclose(output.reshape(seq_len, hidden_size), ref_out, atol=1e-5)
    assert jnp.allclose(h_n.reshape(1, hidden_size), ref_h, atol=1e-5)
    assert jnp.allclose(c_n.reshape(1, hidden_size), ref_c, atol=1e-5)

    print("KERNEL_OK")
</pallas_src>

<mosaic_0001>
module attributes {stable_mosaic.version = 11 : i64} {
  func.func @lstm_kernel(%arg0: memref<8x16xf32, #tpu.memory_space<vmem>>, %arg1: memref<16x128xf32, #tpu.memory_space<vmem>>, %arg2: memref<32x128xf32, #tpu.memory_space<vmem>>, %arg3: memref<1x128xf32, #tpu.memory_space<vmem>>, %arg4: memref<1x32xf32, #tpu.memory_space<vmem>>, %arg5: memref<1x32xf32, #tpu.memory_space<vmem>>, %arg6: memref<9x32xf32, #tpu.memory_space<vmem>>) attributes {dimension_semantics = [], scalar_prefetch = 0 : i64, scratch_operands = 0 : i64, tpu.core_type = #tpu.core_type<tc>} {
    %c0 = arith.constant 0 : index
    %c0_0 = arith.constant 0 : index
    %0 = vector.load %arg0[%c0, %c0_0] : memref<8x16xf32, #tpu.memory_space<vmem>>, vector<8x16xf32>
    %c0_1 = arith.constant 0 : index
    %c0_2 = arith.constant 0 : index
    %1 = vector.load %arg1[%c0_1, %c0_2] : memref<16x128xf32, #tpu.memory_space<vmem>>, vector<16x128xf32>
    %cst = arith.constant dense<0.000000e+00> : vector<8x128xf32>
    %2 = tpu.matmul %0, %1, %cst {dimension_numbers = #tpu.dot_dimension_numbers<[1], [0], [0], [1], [0, 0, 1, 1], [], []>} : vector<8x16xf32>, vector<16x128xf32>, vector<8x128xf32> -> vector<8x128xf32>
    %c0_3 = arith.constant 0 : index
    %c0_4 = arith.constant 0 : index
    %3 = vector.load %arg3[%c0_3, %c0_4] : memref<1x128xf32, #tpu.memory_space<vmem>>, vector<1x128xf32>
    %4 = vector.broadcast %3 : vector<1x128xf32> to vector<8x128xf32>
    %5 = arith.addf %2, %4 : vector<8x128xf32>
    %c0_5 = arith.constant 0 : index
    %c0_6 = arith.constant 0 : index
    %6 = vector.load %arg2[%c0_5, %c0_6] : memref<32x128xf32, #tpu.memory_space<vmem>>, vector<32x128xf32>
    %7 = tpu.iota {dimensions = array<i32: 1>} : vector<1x128xi32>
    %c64_i32 = arith.constant 64 : i32
    %8 = vector.broadcast %c64_i32 : i32 to vector<1x128xi32>
    %9 = arith.cmpi sge, %7, %8 : vector<1x128xi32>
    %c96_i32 = arith.constant 96 : i32
    %10 = vector.broadcast %c96_i32 : i32 to vector<1x128xi32>
    %11 = arith.cmpi slt, %7, %10 : vector<1x128xi32>
    %12 = arith.andi %9, %11 : vector<1x128xi1>
    %cst_7 = arith.constant 1.000000e+00 : f32
    %cst_8 = arith.constant 5.000000e-01 : f32
    %13 = vector.broadcast %cst_7 : f32 to vector<1x128xf32>
    %14 = vector.broadcast %cst_8 : f32 to vector<1x128xf32>
    %15 = arith.select %12, %13, %14 : vector<1x128xi1>, vector<1x128xf32>
    %cst_9 = arith.constant 0.000000e+00 : f32
    %cst_10 = arith.constant 5.000000e-01 : f32
    %16 = vector.broadcast %cst_9 : f32 to vector<1x128xf32>
    %17 = vector.broadcast %cst_10 : f32 to vector<1x128xf32>
    %18 = arith.select %12, %16, %17 : vector<1x128xi1>, vector<1x128xf32>
    %c0_11 = arith.constant 0 : index
    %c0_12 = arith.constant 0 : index
    %19 = vector.load %arg4[%c0_11, %c0_12] : memref<1x32xf32, #tpu.memory_space<vmem>>, vector<1x32xf32>
    %c0_13 = arith.constant 0 : index
    %c0_14 = arith.constant 0 : index
    %20 = vector.load %arg5[%c0_13, %c0_14] : memref<1x32xf32, #tpu.memory_space<vmem>>, vector<1x32xf32>
    %21 = vector.extract_strided_slice %5 {offsets = [0, 0], sizes = [1, 128], strides = [1, 1]} : vector<8x128xf32> to vector<1x128xf32>
    %cst_15 = arith.constant dense<0.000000e+00> : vector<1x128xf32>
    %22 = tpu.matmul %19, %6, %cst_15 {dimension_numbers = #tpu.dot_dimension_numbers<[1], [0], [0], [1], [0, 0, 1, 1], [], []>} : vector<1x32xf32>, vector<32x128xf32>, vector<1x128xf32> -> vector<1x128xf32>
    %23 = arith.addf %21, %22 : vector<1x128xf32>
    %24 = math.tanh %23 : vector<1x128xf32>
    %25 = arith.mulf %24, %15 : vector<1x128xf32>
    %26 = arith.addf %25, %18 : vector<1x128xf32>
    %27 = vector.extract_strided_slice %26 {offsets = [0, 0], sizes = [1, 32], strides = [1, 1]} : vector<1x128xf32> to vector<1x32xf32>
    %28 = vector.extract_strided_slice %26 {offsets = [0, 32], sizes = [1, 32], strides = [1, 1]} : vector<1x128xf32> to vector<1x32xf32>
    %29 = vector.extract_strided_slice %26 {offsets = [0, 64], sizes = [1, 32], strides = [1, 1]} : vector<1x128xf32> to vector<1x32xf32>
    %30 = vector.extract_strided_slice %26 {offsets = [0, 96], sizes = [1, 32], strides = [1, 1]} : vector<1x128xf32> to vector<1x32xf32>
    %31 = arith.mulf %28, %20 : vector<1x32xf32>
    %32 = arith.mulf %27, %29 : vector<1x32xf32>
    %33 = arith.addf %31, %32 : vector<1x32xf32>
    %34 = math.tanh %33 : vector<1x32xf32>
    %35 = arith.mulf %30, %34 : vector<1x32xf32>
    %c0_16 = arith.constant 0 : index
    %c0_17 = arith.constant 0 : index
    %36 = vector.load %arg6[%c0_16, %c0_17] : memref<9x32xf32, #tpu.memory_space<vmem>>, vector<1x32xf32>
    tpu.vector_store %arg6[%c0_16, %c0_17], %35 {strides = array<i32>} : memref<9x32xf32, #tpu.memory_space<vmem>>, vector<1x32xf32>,
    %37 = vector.extract_strided_slice %5 {offsets = [1, 0], sizes = [1, 128], strides = [1, 1]} : vector<8x128xf32> to vector<1x128xf32>
    %cst_18 = arith.constant dense<0.000000e+00> : vector<1x128xf32>
    %38 = tpu.matmul %35, %6, %cst_18 {dimension_numbers = #tpu.dot_dimension_numbers<[1], [0], [0], [1], [0, 0, 1, 1], [], []>} : vector<1x32xf32>, vector<32x128xf32>, vector<1x128xf32> -> vector<1x128xf32>
    %39 = arith.addf %37, %38 : vector<1x128xf32>
    %40 = math.tanh %39 : vector<1x128xf32>
    %41 = arith.mulf %40, %15 : vector<1x128xf32>
    %42 = arith.addf %41, %18 : vector<1x128xf32>
    %43 = vector.extract_strided_slice %42 {offsets = [0, 0], sizes = [1, 32], strides = [1, 1]} : vector<1x128xf32> to vector<1x32xf32>
    %44 = vector.extract_strided_slice %42 {offsets = [0, 32], sizes = [1, 32], strides = [1, 1]} : vector<1x128xf32> to vector<1x32xf32>
    %45 = vector.extract_strided_slice %42 {offsets = [0, 64], sizes = [1, 32], strides = [1, 1]} : vector<1x128xf32> to vector<1x32xf32>
    %46 = vector.extract_strided_slice %42 {offsets = [0, 96], sizes = [1, 32], strides = [1, 1]} : vector<1x128xf32> to vector<1x32xf32>
    %47 = arith.mulf %44, %33 : vector<1x32xf32>
    %48 = arith.mulf %43, %45 : vector<1x32xf32>
    %49 = arith.addf %47, %48 : vector<1x32xf32>
    %50 = math.tanh %49 : vector<1x32xf32>
    %51 = arith.mulf %46, %50 : vector<1x32xf32>
    %c1 = arith.constant 1 : index
    %c0_19 = arith.constant 0 : index
    %52 = vector.load %arg6[%c1, %c0_19] : memref<9x32xf32, #tpu.memory_space<vmem>>, vector<1x32xf32>
    tpu.vector_store %arg6[%c1, %c0_19], %51 {strides = array<i32>} : memref<9x32xf32, #tpu.memory_space<vmem>>, vector<1x32xf32>,
    %53 = vector.extract_strided_slice %5 {offsets = [2, 0], sizes = [1, 128], strides = [1, 1]} : vector<8x128xf32> to vector<1x128xf32>
    %cst_20 = arith.constant dense<0.000000e+00> : vector<1x128xf32>
    %54 = tpu.matmul %51, %6, %cst_20 {dimension_numbers = #tpu.dot_dimension_numbers<[1], [0], [0], [1], [0, 0, 1, 1], [], []>} : vector<1x32xf32>, vector<32x128xf32>, vector<1x128xf32> -> vector<1x128xf32>
    %55 = arith.addf %53, %54 : vector<1x128xf32>
    %56 = math.tanh %55 : vector<1x128xf32>
    %57 = arith.mulf %56, %15 : vector<1x128xf32>
    %58 = arith.addf %57, %18 : vector<1x128xf32>
    %59 = vector.extract_strided_slice %58 {offsets = [0, 0], sizes = [1, 32], strides = [1, 1]} : vector<1x128xf32> to vector<1x32xf32>
    %60 = vector.extract_strided_slice %58 {offsets = [0, 32], sizes = [1, 32], strides = [1, 1]} : vector<1x128xf32> to vector<1x32xf32>
    %61 = vector.extract_strided_slice %58 {offsets = [0, 64], sizes = [1, 32], strides = [1, 1]} : vector<1x128xf32> to vector<1x32xf32>
    %62 = vector.extract_strided_slice %58 {offsets = [0, 96], sizes = [1, 32], strides = [1, 1]} : vector<1x128xf32> to vector<1x32xf32>
    %63 = arith.mulf %60, %49 : vector<1x32xf32>
    %64 = arith.mulf %59, %61 : vector<1x32xf32>
    %65 = arith.addf %63, %64 : vector<1x32xf32>
    %66 = math.tanh %65 : vector<1x32xf32>
    %67 = arith.mulf %62, %66 : vector<1x32xf32>
    %c2 = arith.constant 2 : index
    %c0_21 = arith.constant 0 : index
    %68 = vector.load %arg6[%c2, %c0_21] : memref<9x32xf32, #tpu.memory_space<vmem>>, vector<1x32xf32>
    tpu.vector_store %arg6[%c2, %c0_21], %67 {strides = array<i32>} : memref<9x32xf32, #tpu.memory_space<vmem>>, vector<1x32xf32>,
    %69 = vector.extract_strided_slice %5 {offsets = [3, 0], sizes = [1, 128], strides = [1, 1]} : vector<8x128xf32> to vector<1x128xf32>
    %cst_22 = arith.constant dense<0.000000e+00> : vector<1x128xf32>
    %70 = tpu.matmul %67, %6, %cst_22 {dimension_numbers = #tpu.dot_dimension_numbers<[1], [0], [0], [1], [0, 0, 1, 1], [], []>} : vector<1x32xf32>, vector<32x128xf32>, vector<1x128xf32> -> vector<1x128xf32>
    %71 = arith.addf %69, %70 : vector<1x128xf32>
    %72 = math.tanh %71 : vector<1x128xf32>
    %73 = arith.mulf %72, %15 : vector<1x128xf32>
    %74 = arith.addf %73, %18 : vector<1x128xf32>
    %75 = vector.extract_strided_slice %74 {offsets = [0, 0], sizes = [1, 32], strides = [1, 1]} : vector<1x128xf32> to vector<1x32xf32>
    %76 = vector.extract_strided_slice %74 {offsets = [0, 32], sizes = [1, 32], strides = [1, 1]} : vector<1x128xf32> to vector<1x32xf32>
    %77 = vector.extract_strided_slice %74 {offsets = [0, 64], sizes = [1, 32], strides = [1, 1]} : vector<1x128xf32> to vector<1x32xf32>
    %78 = vector.extract_strided_slice %74 {offsets = [0, 96], sizes = [1, 32], strides = [1, 1]} : vector<1x128xf32> to vector<1x32xf32>
    %79 = arith.mulf %76, %65 : vector<1x32xf32>
    %80 = arith.mulf %75, %77 : vector<1x32xf32>
    %81 = arith.addf %79, %80 : vector<1x32xf32>
    %82 = math.tanh %81 : vector<1x32xf32>
    %83 = arith.mulf %78, %82 : vector<1x32xf32>
    %c3 = arith.constant 3 : index
    %c0_23 = arith.constant 0 : index
    %84 = vector.load %arg6[%c3, %c0_23] : memref<9x32xf32, #tpu.memory_space<vmem>>, vector<1x32xf32>
    tpu.vector_store %arg6[%c3, %c0_23], %83 {strides = array<i32>} : memref<9x32xf32, #tpu.memory_space<vmem>>, vector<1x32xf32>,
    %85 = vector.extract_strided_slice %5 {offsets = [4, 0], sizes = [1, 128], strides = [1, 1]} : vector<8x128xf32> to vector<1x128xf32>
    %cst_24 = arith.constant dense<0.000000e+00> : vector<1x128xf32>
    %86 = tpu.matmul %83, %6, %cst_24 {dimension_numbers = #tpu.dot_dimension_numbers<[1], [0], [0], [1], [0, 0, 1, 1], [], []>} : vector<1x32xf32>, vector<32x128xf32>, vector<1x128xf32> -> vector<1x128xf32>
    %87 = arith.addf %85, %86 : vector<1x128xf32>
    %88 = math.tanh %87 : vector<1x128xf32>
    %89 = arith.mulf %88, %15 : vector<1x128xf32>
    %90 = arith.addf %89, %18 : vector<1x128xf32>
    %91 = vector.extract_strided_slice %90 {offsets = [0, 0], sizes = [1, 32], strides = [1, 1]} : vector<1x128xf32> to vector<1x32xf32>
    %92 = vector.extract_strided_slice %90 {offsets = [0, 32], sizes = [1, 32], strides = [1, 1]} : vector<1x128xf32> to vector<1x32xf32>
    %93 = vector.extract_strided_slice %90 {offsets = [0, 64], sizes = [1, 32], strides = [1, 1]} : vector<1x128xf32> to vector<1x32xf32>
    %94 = vector.extract_strided_slice %90 {offsets = [0, 96], sizes = [1, 32], strides = [1, 1]} : vector<1x128xf32> to vector<1x32xf32>
    %95 = arith.mulf %92, %81 : vector<1x32xf32>
    %96 = arith.mulf %91, %93 : vector<1x32xf32>
    %97 = arith.addf %95, %96 : vector<1x32xf32>
    %98 = math.tanh %97 : vector<1x32xf32>
    %99 = arith.mulf %94, %98 : vector<1x32xf32>
    %c4 = arith.constant 4 : index
    %c0_25 = arith.constant 0 : index
    %100 = vector.load %arg6[%c4, %c0_25] : memref<9x32xf32, #tpu.memory_space<vmem>>, vector<1x32xf32>
    tpu.vector_store %arg6[%c4, %c0_25], %99 {strides = array<i32>} : memref<9x32xf32, #tpu.memory_space<vmem>>, vector<1x32xf32>,
    %101 = vector.extract_strided_slice %5 {offsets = [5, 0], sizes = [1, 128], strides = [1, 1]} : vector<8x128xf32> to vector<1x128xf32>
    %cst_26 = arith.constant dense<0.000000e+00> : vector<1x128xf32>
    %102 = tpu.matmul %99, %6, %cst_26 {dimension_numbers = #tpu.dot_dimension_numbers<[1], [0], [0], [1], [0, 0, 1, 1], [], []>} : vector<1x32xf32>, vector<32x128xf32>, vector<1x128xf32> -> vector<1x128xf32>
    %103 = arith.addf %101, %102 : vector<1x128xf32>
    %104 = math.tanh %103 : vector<1x128xf32>
    %105 = arith.mulf %104, %15 : vector<1x128xf32>
    %106 = arith.addf %105, %18 : vector<1x128xf32>
    %107 = vector.extract_strided_slice %106 {offsets = [0, 0], sizes = [1, 32], strides = [1, 1]} : vector<1x128xf32> to vector<1x32xf32>
    %108 = vector.extract_strided_slice %106 {offsets = [0, 32], sizes = [1, 32], strides = [1, 1]} : vector<1x128xf32> to vector<1x32xf32>
    %109 = vector.extract_strided_slice %106 {offsets = [0, 64], sizes = [1, 32], strides = [1, 1]} : vector<1x128xf32> to vector<1x32xf32>
    %110 = vector.extract_strided_slice %106 {offsets = [0, 96], sizes = [1, 32], strides = [1, 1]} : vector<1x128xf32> to vector<1x32xf32>
    %111 = arith.mulf %108, %97 : vector<1x32xf32>
    %112 = arith.mulf %107, %109 : vector<1x32xf32>
    %113 = arith.addf %111, %112 : vector<1x32xf32>
    %114 = math.tanh %113 : vector<1x32xf32>
    %115 = arith.mulf %110, %114 : vector<1x32xf32>
    %c5 = arith.constant 5 : index
    %c0_27 = arith.constant 0 : index
    %116 = vector.load %arg6[%c5, %c0_27] : memref<9x32xf32, #tpu.memory_space<vmem>>, vector<1x32xf32>
    tpu.vector_store %arg6[%c5, %c0_27], %115 {strides = array<i32>} : memref<9x32xf32, #tpu.memory_space<vmem>>, vector<1x32xf32>,
    %117 = vector.extract_strided_slice %5 {offsets = [6, 0], sizes = [1, 128], strides = [1, 1]} : vector<8x128xf32> to vector<1x128xf32>
    %cst_28 = arith.constant dense<0.000000e+00> : vector<1x128xf32>
    %118 = tpu.matmul %115, %6, %cst_28 {dimension_numbers = #tpu.dot_dimension_numbers<[1], [0], [0], [1], [0, 0, 1, 1], [], []>} : vector<1x32xf32>, vector<32x128xf32>, vector<1x128xf32> -> vector<1x128xf32>
    %119 = arith.addf %117, %118 : vector<1x128xf32>
    %120 = math.tanh %119 : vector<1x128xf32>
    %121 = arith.mulf %120, %15 : vector<1x128xf32>
    %122 = arith.addf %121, %18 : vector<1x128xf32>
    %123 = vector.extract_strided_slice %122 {offsets = [0, 0], sizes = [1, 32], strides = [1, 1]} : vector<1x128xf32> to vector<1x32xf32>
    %124 = vector.extract_strided_slice %122 {offsets = [0, 32], sizes = [1, 32], strides = [1, 1]} : vector<1x128xf32> to vector<1x32xf32>
    %125 = vector.extract_strided_slice %122 {offsets = [0, 64], sizes = [1, 32], strides = [1, 1]} : vector<1x128xf32> to vector<1x32xf32>
    %126 = vector.extract_strided_slice %122 {offsets = [0, 96], sizes = [1, 32], strides = [1, 1]} : vector<1x128xf32> to vector<1x32xf32>
    %127 = arith.mulf %124, %113 : vector<1x32xf32>
    %128 = arith.mulf %123, %125 : vector<1x32xf32>
    %129 = arith.addf %127, %128 : vector<1x32xf32>
    %130 = math.tanh %129 : vector<1x32xf32>
    %131 = arith.mulf %126, %130 : vector<1x32xf32>
    %c6 = arith.constant 6 : index
    %c0_29 = arith.constant 0 : index
    %132 = vector.load %arg6[%c6, %c0_29] : memref<9x32xf32, #tpu.memory_space<vmem>>, vector<1x32xf32>
    tpu.vector_store %arg6[%c6, %c0_29], %131 {strides = array<i32>} : memref<9x32xf32, #tpu.memory_space<vmem>>, vector<1x32xf32>,
    %133 = vector.extract_strided_slice %5 {offsets = [7, 0], sizes = [1, 128], strides = [1, 1]} : vector<8x128xf32> to vector<1x128xf32>
    %cst_30 = arith.constant dense<0.000000e+00> : vector<1x128xf32>
    %134 = tpu.matmul %131, %6, %cst_30 {dimension_numbers = #tpu.dot_dimension_numbers<[1], [0], [0], [1], [0, 0, 1, 1], [], []>} : vector<1x32xf32>, vector<32x128xf32>, vector<1x128xf32> -> vector<1x128xf32>
    %135 = arith.addf %133, %134 : vector<1x128xf32>
    %136 = math.tanh %135 : vector<1x128xf32>
    %137 = arith.mulf %136, %15 : vector<1x128xf32>
    %138 = arith.addf %137, %18 : vector<1x128xf32>
    %139 = vector.extract_strided_slice %138 {offsets = [0, 0], sizes = [1, 32], strides = [1, 1]} : vector<1x128xf32> to vector<1x32xf32>
    %140 = vector.extract_strided_slice %138 {offsets = [0, 32], sizes = [1, 32], strides = [1, 1]} : vector<1x128xf32> to vector<1x32xf32>
    %141 = vector.extract_strided_slice %138 {offsets = [0, 64], sizes = [1, 32], strides = [1, 1]} : vector<1x128xf32> to vector<1x32xf32>
    %142 = vector.extract_strided_slice %138 {offsets = [0, 96], sizes = [1, 32], strides = [1, 1]} : vector<1x128xf32> to vector<1x32xf32>
    %143 = arith.mulf %140, %129 : vector<1x32xf32>
    %144 = arith.mulf %139, %141 : vector<1x32xf32>
    %145 = arith.addf %143, %144 : vector<1x32xf32>
    %146 = math.tanh %145 : vector<1x32xf32>
    %147 = arith.mulf %142, %146 : vector<1x32xf32>
    %c7 = arith.constant 7 : index
    %c0_31 = arith.constant 0 : index
    %148 = vector.load %arg6[%c7, %c0_31] : memref<9x32xf32, #tpu.memory_space<vmem>>, vector<1x32xf32>
    tpu.vector_store %arg6[%c7, %c0_31], %147 {strides = array<i32>} : memref<9x32xf32, #tpu.memory_space<vmem>>, vector<1x32xf32>,
    %c8 = arith.constant 8 : index
    %c0_32 = arith.constant 0 : index
    %149 = vector.load %arg6[%c8, %c0_32] : memref<9x32xf32, #tpu.memory_space<vmem>>, vector<1x32xf32>
    tpu.vector_store %arg6[%c8, %c0_32], %145 {strides = array<i32>} : memref<9x32xf32, #tpu.memory_space<vmem>>, vector<1x32xf32>,
    return
  }
}

</mosaic_0001>

<bundles_post_ra>
// kernel: username_encoder_forward.1
= control target key start
LH: loop header
LB: loop body
LE: loop exit
PB: predicated region body
PF: predicated region fallthrough
CT: control target
= control target key end

     0   :  { %11 = vsyncpa [#allocation3], 0  ;;  %s1570_s0 = inlined_call_operand.vmem [shape: f32[8,16], index: 0, kind: input, shape index: {}]   ;;  %s1571_s1 = inlined_call_operand.vmem [shape: f32[16,128], index: 1, kind: input, shape index: {}]   ;;  %s1572_s2 = inlined_call_operand.hbm [shape: f32[32,128], index: 2, kind: input, shape index: {}]   ;;  %s1573_s3 = inlined_call_operand.vmem [shape: f32[1,128], index: 3, kind: input, shape index: {}]   ;;  %s1574_s4 = inlined_call_operand.vmem [shape: f32[1,32], index: 4, kind: input, shape index: {}]   ;;  %s1575_s5 = inlined_call_operand.hbm [shape: f32[1,32], index: 5, kind: input, shape index: {}]   ;;  %s1576_s6 = inlined_call_operand.vmem [shape: f32[9,32], index: 6, kind: output, shape index: {}]  }
   0x1   :  { %12 = vsyncpa [#allocation5], 0  ;;  %s1310_s21 = smov [#allocation2]   ;;  %s1262_s25 = scalar_lea.hbm %s1572_s2, 512 }
   0x2   :  { %s22_s22 = sshll.u32 %s1310_s21, 4  ;;  %p1263_p0 = scmp.ne.s32.totalorder %s1572_s2, %s1262_s25  ;;  %s23_s22 = int_to_ptr.vmem [resolvable:$true] %s22_s22 }
   0x3   :  { %p1266_p1 = scmp.lt.u32.totalorder %s1262_s25, %s1572_s2 }
   0x5   :  { %p1268_p2 = pnand %p1266_p1, %p1263_p0 }
   0x7   :  { %1271 = shalt.err (!%p1268_p2)
}
   0x8   :  { %s1272_s30 = scalar_lea.vmem %s23_s22, 512  ;;  %p1277_p4 = scmp.lt.s32.totalorder %s23_s22, %s23_s22 }
   0x9   :  { %p1273_p3 = scmp.ne.s32.totalorder %s23_s22, %s1272_s30  ;;  %p1278_p5 = scmp.lt.s32.totalorder %s1272_s30, %s1272_s30 }
   0xb   :  { %p1279_p6 = por %p1278_p5, %p1277_p4 }
   0xd   :  { %p1280_p7 = pnand %p1279_p6, %p1273_p3 }
   0xf   :  { %1283 = shalt.err (!%p1280_p7)
}
  0x10   :  { %s1311_s7 = smov 128   ;;  %s1312_s8 = smov 8  }
  0x11   :  { %28 = dma.hbm_to_vmem [thread:$0]  %s1572_s2, 512, %s23_s22, [#allocation3], %s1311_s7, %s1311_s7, %s1312_s8  }
  0x12   :  { %s1313_s11 = smov [#allocation4]   ;;  %s1284_s15 = scalar_lea.hbm %s1575_s5, 16 }
  0x13   :  { %s39_s12 = sshll.u32 %s1313_s11, 4  ;;  %p1285_p8 = scmp.ne.s32.totalorder %s1575_s5, %s1284_s15  ;;  %s40_s12 = int_to_ptr.vmem [resolvable:$true] %s39_s12 }
  0x14   :  { %p1288_p9 = scmp.lt.u32.totalorder %s1284_s15, %s1575_s5 }
  0x16   :  { %p1290_p10 = pnand %p1288_p9, %p1285_p8 }
  0x18   :  { %1293 = shalt.err (!%p1290_p10)
}
  0x19   :  { %s1294_s20 = scalar_lea.vmem %s40_s12, 16  ;;  %s1298_s2 = scalar_lea.vmem %s40_s12, 32 }
  0x1a   :  { %p1295_p11 = scmp.ne.s32.totalorder %s40_s12, %s1294_s20  ;;  %p1299_p12 = scmp.lt.s32.totalorder %s40_s12, %s40_s12 }
  0x1b   :  { %p1300_p13 = scmp.lt.s32.totalorder %s1298_s2, %s1294_s20 }
  0x1d   :  { %p1301_p0 = por %p1300_p13, %p1299_p12 }
  0x1f   :  { %p1302_p1 = pnand %p1301_p0, %p1295_p11 }
  0x21   :  { %1305 = shalt.err (!%p1302_p1)
}
  0x22   :  { %42 = dma.hbm_to_vmem [thread:$0]  %s1575_s5, 16, %s40_s12, [#allocation5]  }
  0x23   :  { %1306 = dma.done.wait [#allocation3], 512  }
  0x24   :  { %1307 = vsyncadd [#allocation3], 4294966784 }
  0x25   :  { %1308 = dma.done.wait [#allocation5], 16  }
  0x26   :  { %1309 = vsyncadd [#allocation5], 4294967280  ;;  %v1314_v0 = vmov 0.0|0.0   ;;  %vm1315_vm0 = vmmov 0   ;;  %v1316_v1 = vmov 0.0   ;;  %v133_v2 = vld [vmem:[#allocation2] sm:$0xff]  ;;  %v137_v15 = vlaneseq }
  0x27   :  { %1171 = vmatprep.subr.bf16.mxu1 %v1314_v0  ;;  %1168 = vmatprep.subr.bf16.mxu0 %v1314_v0  ;;  %v134_v3 = vld [vmem:[#allocation2 + $0x8] sm:$0xff]  ;;  %v50_v4 = vld [vmem:[%s1571_s1] sm:$0xff]  ;;  %v135_v7 = vld [vmem:[#allocation2 + $0x10] sm:$0xff]  ;;  %vm59_vm1 = vcmask 130048   ;;  %vm146_vm2 = vcmask 261120   ;;  %v1317_v22 = vmov 0.5  }
  0x28   :  { %1077 = vmatprep.mubr.msk.f32.mxu0 %vm1315_vm0, %v1316_v1  ;;  %1088 = vmatprep.mubr.msk.f32.mxu1 %vm1315_vm0, %v1316_v1  ;;  %v1389_v5 = vpack.c.bf16 %v134_v3, %v133_v2  ;;  %v51_v6 = vld [vmem:[%s1571_s1 + $0x8] sm:$0xff]  ;;  %v136_v9 = vld [vmem:[#allocation2 + $0x18] sm:$0xff]  ;;  %v49_v11 = vld [vmem:[%s1570_s0] sm:$0xff]  ;;  %v138_v21 = vand.u32 127, %v137_v15  ;;  %s1319_s29 = smov 32   ;;  %vm253_vm6 = vcmask 253952  }
  0x29   :  { %v1169_v8 = vpack.c.bf16 %v51_v6, %v50_v4  ;;  %v1395_v10 = vpack.c.bf16 %v136_v9, %v135_v7  ;;  %v144_v12 = vld [vmem:[%s1574_s4] sm:$0x1]  ;;  %vm358_vm7 = vcmask 254977   ;;  %vm574_vm8 = vcmask 257027   ;;  %s1320_s14 = smov 96  }
  0x2a   :  { %1173 = vmatpush3.bf16.msra.mxu1 %v1389_v5  ;;  %v1019_v13 = vld [vmem:[%s1573_s3] ss:$0 sm:$0xff]  ;;  %vm139_vm3 = vcmp.ge.s32.totalorder %v138_v21, 64  ;;  %vm140_vm4 = vcmp.lt.s32.totalorder %v138_v21, 96  ;;  %s1318_s3 = smov 64   ;;  %vm790_vm9 = vcmask 259077  }
  0x2b   :  { %1170 = vmatpush3.bf16.msra.mxu0 %v1169_v8  ;;  %1174 = vmatprep.subr.bf16.mxu1 %v1314_v0  ;;  %vm141_vm5 = vmand %vm139_vm3, %vm140_vm4  ;;  %v1022_v28 = vld [vmem:[#allocation4] ss:$0 sm:$0xff]  ;;  %vm466_vm10 = vcmask 256002   ;;  %vm682_vm11 = vcmask 258052   ;;  %vm898_vm12 = vcmask 260102   ;;  %vm1006_vm13 = vcmask 261127  }
  0x2c   :  { %1177 = vmatprep.subr.bf16.mxu0 %v1314_v0  ;;  %v1426_v23 = vsel %vm141_vm5, 1.0, %v1317_v22  ;;  %v1428_v25 = vsel %vm141_vm5, 0.0, %v1317_v22 }
  0x2e   :  { %1078 = vmatmul.mubr.msk.f32.vlgmr.msra.gmra.mrb[0].mxu0 %vm59_vm1, %v49_v11  ;;  %1176 = vmatpush3.bf16.msra.mxu1 %v1395_v10 }
  0x2f   :  { %1179 = vmatpush3.bf16.msra.mxu0 %v1389_v5  ;;  %1099 = vmatprep.mubr.msk.f32.mxu0 %vm1315_vm0, %v1316_v1 }
  0x30   :  { %1180 = vmatprep.subr.bf16.mxu0 %v1314_v0  ;;  %1183 = vmatprep.subr.bf16.mxu1 %v1314_v0 }
  0x31   :  { %1089 = vmatmul.mubr.msk.f32.vlgmr.msra.gmra.mrb[0].mxu1 %vm146_vm2, %v144_v12 }
  0x32   :  { %1185 = vmatpush3.bf16.msra.mxu1 %v1389_v5  ;;  %1110 = vmatprep.mubr.msk.f32.mxu1 %vm1315_vm0, %v1316_v1 }
  0x33   :  { %1182 = vmatpush3.bf16.msra.mxu0 %v1395_v10  ;;  %1186 = vmatprep.subr.bf16.mxu1 %v1314_v0 }
  0x34   :  { %1189 = vmatprep.subr.bf16.mxu0 %v1314_v0 }
  0x36   :  { %1188 = vmatpush3.bf16.msra.mxu1 %v1395_v10 }
  0x37   :  { %1195 = vmatprep.subr.bf16.mxu1 %v1314_v0 }
 0x101   :  { %v129_v14 = vpop.f32.mrb[0].mxu0 }
 0x102   :  { %v1423_v16 = vadd.f32 %v1019_v13, %v129_v14  ;;  %v1079_v17 = vpop.f32.mrb[1].mxu0 }
 0x104   :  { %v216_v18 = vpop.f32.mrb[0].mxu1 }
 0x105   :  { %v220_v19 = vadd.f32 %v216_v18, %v1423_v16  ;;  %v1090_v20 = vpop.f32.mrb[1].mxu1 }
 0x107   :  { %1230 = vtanh.f32 %v220_v19 }
 0x111   :  { %v1231_v24 = vpop.eup %1230 }
 0x112   :  { %v222_v26 = vmul.f32 %v1231_v24, %v1426_v23 }
 0x114   :  { %v223_v27 = vadd.f32 %v222_v26, %v1428_v25 }
 0x116   :  { %234 = vrot.lane.b32.xlu0 %v223_v27, %s1318_s3 }
 0x11a   :  { %229 = vrot.lane.b32.xlu0 %v1022_v28, %s1319_s29 }
 0x188   :  { %v235_v29 = vpop.permute.xlu0 %234 }
 0x189   :  { %v237_v30 = vmul.f32 %v235_v29, %v223_v27 }
 0x18b   :  { %239 = vrot.lane.b32.xlu1 %v237_v30, %s1319_s29 }
 0x18c   :  { %v230_v31 = vpop.permute.xlu0 %229 }
 0x18d   :  { %v232_v32 = vmul.f32 %v230_v31, %v223_v27 }
 0x1fd   :  { %v240_v33 = vpop.permute.xlu1 %239 }
 0x1fe   :  { %v242_v34 = vadd.f32 %v240_v33, %v232_v32 }
 0x200   :  { %1232 = vtanh.f32 %v242_v34  ;;  %v335_v48 = vrot.slane %v242_v34, 7 }
 0x20a   :  { %v1233_v35 = vpop.eup %1232 }
 0x20b   :  { %245 = vrot.lane.b32.xlu1 %v1233_v35, %s1318_s3 }
 0x27d   :  { %v246_v36 = vpop.permute.xlu1 %245 }
 0x27e   :  { %v248_v37 = vmul.f32 %v246_v36, %v223_v27 }
 0x280   :  { %250 = vrot.lane.b32.xlu0 %v248_v37, %s1319_s29 }
 0x2f2   :  { %v251_v38 = vpop.permute.xlu0 %250 }
 0x2f3   :  { %254 = vst.msk [vmem:[%s1576_s6] sm:$0x1] %vm253_vm6, %v251_v38  ;;  %1100 = vmatmul.mubr.msk.f32.vlgmr.msra.gmra.mrb[2].mxu0 %vm146_vm2, %v251_v38 }
 0x2f4   :  { %1191 = vmatpush3.bf16.msra.mxu0 %v1389_v5  ;;  %1121 = vmatprep.mubr.msk.f32.mxu0 %vm1315_vm0, %v1316_v1 }
 0x2f5   :  { %1192 = vmatprep.subr.bf16.mxu0 %v1314_v0 }
 0x2f8   :  { %1194 = vmatpush3.bf16.msra.mxu0 %v1395_v10 }
 0x2f9   :  { %1201 = vmatprep.subr.bf16.mxu0 %v1314_v0 }
 0x3c6   :  { %v323_v39 = vpop.f32.mrb[2].mxu0 }
 0x3c7   :  { %v328_v40 = vrot.slane %v323_v39, 7  ;;  %v1101_v41 = vpop.f32.mrb[3].mxu0 }
 0x3c9   :  { %v330_v42 = vadd.f32 %v328_v40, %v1423_v16 }
 0x3cb   :  { %1234 = vtanh.f32 %v330_v42 }
 0x3d5   :  { %v1235_v43 = vpop.eup %1234 }
 0x3d6   :  { %v332_v44 = vmul.f32 %v1235_v43, %v1426_v23 }
 0x3d8   :  { %v333_v45 = vadd.f32 %v332_v44, %v1428_v25 }
 0x3da   :  { %339 = vrot.lane.b32.xlu1 %v333_v45, %s1318_s3  ;;  %v337_v49 = vmul.f32 %v335_v48, %v333_v45 }
 0x44c   :  { %v340_v46 = vpop.permute.xlu1 %339 }
 0x44d   :  { %v342_v47 = vmul.f32 %v340_v46, %v333_v45 }
 0x44f   :  { %344 = vrot.lane.b32.xlu0 %v342_v47, %s1319_s29 }
 0x4c1   :  { %v345_v50 = vpop.permute.xlu0 %344 }
 0x4c2   :  { %v347_v51 = vadd.f32 %v345_v50, %v337_v49 }
 0x4c4   :  { %1236 = vtanh.f32 %v347_v51  ;;  %v443_v4 = vrot.slane %v347_v51, 7 }
 0x4ce   :  { %v1237_v52 = vpop.eup %1236 }
 0x4cf   :  { %350 = vrot.lane.b32.xlu1 %v1237_v52, %s1318_s3 }
 0x541   :  { %v351_v53 = vpop.permute.xlu1 %350 }
 0x542   :  { %v1453_v54 = vmul.f32 %v351_v53, %v333_v45 }
 0x544   :  { %v360_v55 = vrot.slane %v1453_v54, 1 }
 0x546   :  { %361 = vrot.lane.b32.xlu0 %v360_v55, %s1319_s29 }
 0x5b8   :  { %v362_v56 = vpop.permute.xlu0 %361 }
 0x5b9   :  { %1111 = vmatmul.mubr.msk.f32.vlgmr.msra.gmra.mrb[2].mxu1 %vm146_vm2, %v362_v56 }
 0x5ba   :  { %1197 = vmatpush3.bf16.msra.mxu1 %v1389_v5  ;;  %1132 = vmatprep.mubr.msk.f32.mxu1 %vm1315_vm0, %v1316_v1 }
 0x5bb   :  { %1198 = vmatprep.subr.bf16.mxu1 %v1314_v0 }
 0x5be   :  { %1200 = vmatpush3.bf16.msra.mxu1 %v1395_v10 }
 0x5bf   :  { %1207 = vmatprep.subr.bf16.mxu1 %v1314_v0 }
 0x68c   :  { %v431_v57 = vpop.f32.mrb[2].mxu1 }
 0x68d   :  { %v436_v58 = vrot.slane %v431_v57, 6  ;;  %v1112_v59 = vpop.f32.mrb[3].mxu1 }
 0x68f   :  { %v438_v60 = vadd.f32 %v436_v58, %v1423_v16 }
 0x691   :  { %1238 = vtanh.f32 %v438_v60 }
 0x69b   :  { %v1239_v61 = vpop.eup %1238 }
 0x69c   :  { %v440_v62 = vmul.f32 %v1239_v61, %v1426_v23 }
 0x69e   :  { %v441_v63 = vadd.f32 %v440_v62, %v1428_v25 }
 0x6a0   :  { %447 = vrot.lane.b32.xlu1 %v441_v63, %s1318_s3  ;;  %v445_v6 = vmul.f32 %v443_v4, %v441_v63 }
 0x712   :  { %v448_v2 = vpop.permute.xlu1 %447 }
 0x713   :  { %v450_v3 = vmul.f32 %v448_v2, %v441_v63 }
 0x715   :  { %452 = vrot.lane.b32.xlu0 %v450_v3, %s1319_s29 }
 0x787   :  { %v453_v7 = vpop.permute.xlu0 %452 }
 0x788   :  { %v455_v8 = vadd.f32 %v453_v7, %v445_v6 }
 0x78a   :  { %1240 = vtanh.f32 %v455_v8  ;;  %v551_v27 = vrot.slane %v455_v8, 7 }
 0x794   :  { %v1241_v9 = vpop.eup %1240 }
 0x795   :  { %458 = vrot.lane.b32.xlu1 %v1241_v9, %s1318_s3 }
 0x807   :  { %v459_v11 = vpop.permute.xlu1 %458 }
 0x808   :  { %v1470_v12 = vmul.f32 %v459_v11, %v441_v63 }
 0x80a   :  { %v468_v13 = vrot.slane %v1470_v12, 2 }
 0x80c   :  { %469 = vrot.lane.b32.xlu0 %v468_v13, %s1319_s29 }
 0x87e   :  { %v470_v14 = vpop.permute.xlu0 %469 }
 0x87f   :  { %1122 = vmatmul.mubr.msk.f32.vlgmr.msra.gmra.mrb[4].mxu0 %vm146_vm2, %v470_v14 }
 0x880   :  { %1203 = vmatpush3.bf16.msra.mxu0 %v1389_v5  ;;  %1143 = vmatprep.mubr.msk.f32.mxu0 %vm1315_vm0, %v1316_v1 }
 0x881   :  { %1204 = vmatprep.subr.bf16.mxu0 %v1314_v0 }
 0x884   :  { %1206 = vmatpush3.bf16.msra.mxu0 %v1395_v10 }
 0x885   :  { %1213 = vmatprep.subr.bf16.mxu0 %v1314_v0 }
 0x952   :  { %v539_v15 = vpop.f32.mrb[4].mxu0 }
 0x953   :  { %v544_v17 = vrot.slane %v539_v15, 5  ;;  %v1123_v18 = vpop.f32.mrb[5].mxu0 }
 0x955   :  { %v546_v19 = vadd.f32 %v544_v17, %v1423_v16 }
 0x957   :  { %1242 = vtanh.f32 %v546_v19 }
 0x961   :  { %v1243_v20 = vpop.eup %1242 }
 0x962   :  { %v548_v21 = vmul.f32 %v1243_v20, %v1426_v23 }
 0x964   :  { %v549_v22 = vadd.f32 %v548_v21, %v1428_v25 }
 0x966   :  { %555 = vrot.lane.b32.xlu1 %v549_v22, %s1318_s3  ;;  %v553_v28 = vmul.f32 %v551_v27, %v549_v22 }
 0x9d8   :  { %v556_v24 = vpop.permute.xlu1 %555 }
 0x9d9   :  { %v558_v26 = vmul.f32 %v556_v24, %v549_v22 }
 0x9db   :  { %560 = vrot.lane.b32.xlu0 %v558_v26, %s1319_s29 }
 0xa4d   :  { %v561_v29 = vpop.permute.xlu0 %560 }
 0xa4e   :  { %v563_v30 = vadd.f32 %v561_v29, %v553_v28 }
 0xa50   :  { %1244 = vtanh.f32 %v563_v30  ;;  %v659_v45 = vrot.slane %v563_v30, 7 }
 0xa5a   :  { %v1245_v31 = vpop.eup %1244 }
 0xa5b   :  { %566 = vrot.lane.b32.xlu1 %v1245_v31, %s1318_s3 }
 0xacd   :  { %v567_v32 = vpop.permute.xlu1 %566 }
 0xace   :  { %v1487_v33 = vmul.f32 %v567_v32, %v549_v22 }
 0xad0   :  { %v576_v34 = vrot.slane %v1487_v33, 3 }
 0xad2   :  { %577 = vrot.lane.b32.xlu0 %v576_v34, %s1319_s29 }
 0xb44   :  { %v578_v35 = vpop.permute.xlu0 %577 }
 0xb45   :  { %1133 = vmatmul.mubr.msk.f32.vlgmr.msra.gmra.mrb[4].mxu1 %vm146_vm2, %v578_v35 }
 0xb46   :  { %1209 = vmatpush3.bf16.msra.mxu1 %v1389_v5  ;;  %1154 = vmatprep.mubr.msk.f32.mxu1 %vm1315_vm0, %v1316_v1 }
 0xb47   :  { %1210 = vmatprep.subr.bf16.mxu1 %v1314_v0 }
 0xb4a   :  { %1212 = vmatpush3.bf16.msra.mxu1 %v1395_v10 }
 0xc18   :  { %v647_v36 = vpop.f32.mrb[4].mxu1 }
 0xc19   :  { %v652_v37 = vrot.slane %v647_v36, 4  ;;  %v1134_v38 = vpop.f32.mrb[5].mxu1 }
 0xc1b   :  { %v654_v39 = vadd.f32 %v652_v37, %v1423_v16 }
 0xc1d   :  { %1246 = vtanh.f32 %v654_v39 }
 0xc27   :  { %v1247_v40 = vpop.eup %1246 }
 0xc28   :  { %v656_v41 = vmul.f32 %v1247_v40, %v1426_v23 }
 0xc2a   :  { %v657_v42 = vadd.f32 %v656_v41, %v1428_v25 }
 0xc2c   :  { %663 = vrot.lane.b32.xlu1 %v657_v42, %s1318_s3  ;;  %v661_v46 = vmul.f32 %v659_v45, %v657_v42 }
 0xc9e   :  { %v664_v43 = vpop.permute.xlu1 %663 }
 0xc9f   :  { %v666_v44 = vmul.f32 %v664_v43, %v657_v42 }
 0xca1   :  { %668 = vrot.lane.b32.xlu0 %v666_v44, %s1319_s29 }
 0xd13   :  { %v669_v47 = vpop.permute.xlu0 %668 }
 0xd14   :  { %v671_v48 = vadd.f32 %v669_v47, %v661_v46 }
 0xd16   :  { %1248 = vtanh.f32 %v671_v48 }
 0xd20   :  { %v1249_v49 = vpop.eup %1248 }
 0xd21   :  { %674 = vrot.lane.b32.xlu1 %v1249_v49, %s1318_s3 }
 0xd93   :  { %v675_v50 = vpop.permute.xlu1 %674 }
 0xd94   :  { %v1503_v51 = vmul.f32 %v675_v50, %v657_v42 }
 0xd96   :  { %v684_v52 = vrot.slane %v1503_v51, 4 }
 0xd98   :  { %685 = vrot.lane.b32.xlu0 %v684_v52, %s1319_s29 }
 0xe0a   :  { %v686_v53 = vpop.permute.xlu0 %685 }
 0xe0b   :  { %1144 = vmatmul.mubr.msk.f32.vlgmr.msra.gmra.mrb[6].mxu0 %vm146_vm2, %v686_v53 }
 0xe0c   :  { %1215 = vmatpush3.bf16.msra.mxu0 %v1389_v5  ;;  %1165 = vmatprep.mubr.msk.f32.mxu0 %vm1315_vm0, %v1316_v1 }
 0xe0d   :  { %1216 = vmatprep.subr.bf16.mxu0 %v1314_v0  ;;  %v767_v0 = vrot.slane %v671_v48, 7 }
 0xe10   :  { %1218 = vmatpush3.bf16.msra.mxu0 %v1395_v10 }
 0xede   :  { %v755_v55 = vpop.f32.mrb[6].mxu0 }
 0xedf   :  { %v760_v56 = vrot.slane %v755_v55, 3  ;;  %v1145_v57 = vpop.f32.mrb[7].mxu0 }
 0xee1   :  { %v762_v58 = vadd.f32 %v760_v56, %v1423_v16 }
 0xee3   :  { %1250 = vtanh.f32 %v762_v58 }
 0xeed   :  { %v1251_v59 = vpop.eup %1250 }
 0xeee   :  { %v764_v60 = vmul.f32 %v1251_v59, %v1426_v23 }
 0xef0   :  { %v765_v61 = vadd.f32 %v764_v60, %v1428_v25 }
 0xef2   :  { %771 = vrot.lane.b32.xlu1 %v765_v61, %s1318_s3  ;;  %v769_v1 = vmul.f32 %v767_v0, %v765_v61 }
 0xf64   :  { %v772_v5 = vpop.permute.xlu1 %771 }
 0xf65   :  { %v774_v62 = vmul.f32 %v772_v5, %v765_v61 }
 0xf67   :  { %776 = vrot.lane.b32.xlu0 %v774_v62, %s1319_s29 }
 0xfd9   :  { %v777_v10 = vpop.permute.xlu0 %776 }
 0xfda   :  { %v779_v63 = vadd.f32 %v777_v10, %v769_v1 }
 0xfdc   :  { %1252 = vtanh.f32 %v779_v63  ;;  %v875_v20 = vrot.slane %v779_v63, 7 }
 0xfe6   :  { %v1253_v2 = vpop.eup %1252 }
 0xfe7   :  { %782 = vrot.lane.b32.xlu1 %v1253_v2, %s1318_s3 }
0x1059   :  { %v783_v3 = vpop.permute.xlu1 %782 }
0x105a   :  { %v785_v4 = vmul.f32 %v783_v3, %v765_v61 }
0x105c   :  { %v792_v6 = vrot.slane %v785_v4, 5 }
0x105e   :  { %793 = vrot.lane.b32.xlu0 %v792_v6, %s1319_s29 }
0x10d0   :  { %v794_v7 = vpop.permute.xlu0 %793 }
0x10d1   :  { %1155 = vmatmul.mubr.msk.f32.vlgmr.msra.gmra.mrb[6].mxu1 %vm146_vm2, %v794_v7 }
0x11a4   :  { %v863_v8 = vpop.f32.mrb[6].mxu1 }
0x11a5   :  { %v868_v9 = vrot.slane %v863_v8, 2  ;;  %v1156_v11 = vpop.f32.mrb[7].mxu1 }
0x11a7   :  { %v870_v13 = vadd.f32 %v868_v9, %v1423_v16 }
0x11a9   :  { %1254 = vtanh.f32 %v870_v13 }
0x11b3   :  { %v1255_v14 = vpop.eup %1254 }
0x11b4   :  { %v872_v15 = vmul.f32 %v1255_v14, %v1426_v23 }
0x11b6   :  { %v873_v17 = vadd.f32 %v872_v15, %v1428_v25 }
0x11b8   :  { %879 = vrot.lane.b32.xlu1 %v873_v17, %s1318_s3  ;;  %v877_v21 = vmul.f32 %v875_v20, %v873_v17 }
0x122a   :  { %v880_v18 = vpop.permute.xlu1 %879 }
0x122b   :  { %v882_v19 = vmul.f32 %v880_v18, %v873_v17 }
0x122d   :  { %884 = vrot.lane.b32.xlu0 %v882_v19, %s1319_s29 }
0x129f   :  { %v885_v22 = vpop.permute.xlu0 %884 }
0x12a0   :  { %v887_v24 = vadd.f32 %v885_v22, %v877_v21 }
0x12a2   :  { %1256 = vtanh.f32 %v887_v24 }
0x12ac   :  { %v1257_v26 = vpop.eup %1256 }
0x12ad   :  { %890 = vrot.lane.b32.xlu1 %v1257_v26, %s1318_s3 }
0x131f   :  { %v891_v27 = vpop.permute.xlu1 %890 }
0x1320   :  { %v893_v28 = vmul.f32 %v891_v27, %v873_v17 }
0x1322   :  { %v900_v29 = vrot.slane %v893_v28, 6 }
0x1324   :  { %901 = vrot.lane.b32.xlu0 %v900_v29, %s1319_s29 }
0x1396   :  { %v902_v30 = vpop.permute.xlu0 %901 }
0x1397   :  { %1166 = vmatmul.mubr.msk.f32.vlgmr.msra.gmra.mrb[8].mxu0 %vm146_vm2, %v902_v30 }
0x146a   :  { %v971_v31 = vpop.f32.mrb[8].mxu0 }
0x146b   :  { %v976_v32 = vrot.slane %v971_v31, 1  ;;  %v1167_v34 = vpop.f32.mrb[9].mxu0 }
0x146d   :  { %v978_v35 = vadd.f32 %v976_v32, %v1423_v16  ;;  %v983_v16 = vrot.slane %v887_v24, 7 }
0x146f   :  { %1258 = vtanh.f32 %v978_v35 }
0x1479   :  { %v1259_v36 = vpop.eup %1258 }
0x147a   :  { %v980_v37 = vmul.f32 %v1259_v36, %v1426_v23 }
0x147c   :  { %v981_v38 = vadd.f32 %v980_v37, %v1428_v25 }
0x147e   :  { %987 = vrot.lane.b32.xlu1 %v981_v38, %s1318_s3  ;;  %v985_v41 = vmul.f32 %v983_v16, %v981_v38 }
0x14f0   :  { %v988_v39 = vpop.permute.xlu1 %987 }
0x14f1   :  { %v990_v40 = vmul.f32 %v988_v39, %v981_v38 }
0x14f3   :  { %992 = vrot.lane.b32.xlu0 %v990_v40, %s1319_s29 }
0x14f7   :  { %355 = vrot.lane.b32.xlu0 %v1453_v54, %s1319_s29 }
0x14fb   :  { %571 = vrot.lane.b32.xlu0 %v1487_v33, %s1319_s29 }
0x14ff   :  { %787 = vrot.lane.b32.xlu0 %v785_v4, %s1319_s29 }
0x1565   :  { %v993_v42 = vpop.permute.xlu0 %992 }
0x1566   :  { %v995_v23 = vadd.f32 %v993_v42, %v985_v41 }
0x1568   :  { %1260 = vtanh.f32 %v995_v23 }
0x1569   :  { %v356_v25 = vpop.permute.xlu0 %355 }
0x156a   :  { %359 = vst.msk [vmem:[%s1576_s6] sm:$0x2] %vm358_vm7, %v356_v25 }
0x156d   :  { %v572_v43 = vpop.permute.xlu0 %571 }
0x156e   :  { %575 = vst.msk [vmem:[%s1576_s6] sm:$0x8] %vm574_vm8, %v572_v43 }
0x1571   :  { %v788_v54 = vpop.permute.xlu0 %787 }
0x1572   :  { %v1261_v33 = vpop.eup %1260  ;;  %791 = vst.msk [vmem:[%s1576_s6] sm:$0x20] %vm790_vm9, %v788_v54 }
0x1573   :  { %998 = vrot.lane.b32.xlu1 %v1261_v33, %s1318_s3 }
0x1577   :  { %463 = vrot.lane.b32.xlu1 %v1470_v12, %s1319_s29 }
0x157b   :  { %679 = vrot.lane.b32.xlu1 %v1503_v51, %s1319_s29 }
0x157f   :  { %895 = vrot.lane.b32.xlu1 %v893_v28, %s1319_s29 }
0x1583   :  { %1009 = vrot.lane.b32.xlu1 %v995_v23, %s1320_s14 }
0x15e5   :  { %v999_v44 = vpop.permute.xlu1 %998 }
0x15e6   :  { %v1001_v45 = vmul.f32 %v999_v44, %v981_v38 }
0x15e8   :  { %1003 = vrot.lane.b32.xlu0 %v1001_v45, %s1319_s29 }
0x15e9   :  { %v464_v46 = vpop.permute.xlu1 %463 }
0x15ea   :  { %467 = vst.msk [vmem:[%s1576_s6] sm:$0x4] %vm466_vm10, %v464_v46 }
0x15ed   :  { %v680_v47 = vpop.permute.xlu1 %679 }
0x15ee   :  { %683 = vst.msk [vmem:[%s1576_s6] sm:$0x10] %vm682_vm11, %v680_v47 }
0x15f1   :  { %v896_v12 = vpop.permute.xlu1 %895 }
0x15f2   :  { %899 = vst.msk [vmem:[%s1576_s6] sm:$0x40] %vm898_vm12, %v896_v12 }
0x15f5   :  { %v1010_v48 = vpop.permute.xlu1 %1009 }
0x15f6   :  { %1012 = vst.msk [vmem:[%s1576_s6 + $0x1] sm:$0x80] %vm1006_vm13, %v1010_v48 }
0x165a   :  { %v1004_v49 = vpop.permute.xlu0 %1003 }
0x165b   :  { %1007 = vst.msk [vmem:[%s1576_s6] sm:$0x80] %vm1006_vm13, %v1004_v49 }
0x165c   :  { %1017 = vsyncpa [#allocation3], 1 }
0x165d   :  { %1018 = vsyncpa [#allocation5], 1 }

</bundles_post_ra>
